<compile_context>
chip_gen: v7x
topology: tpu7x:2x2x1
jax: 0.10.0
libtpu: 0.0.40
codegen_flags: <defaults>
</compile_context>

<pallas_src>
import functools

import jax
import jax.numpy as jnp
from jax import lax
from jax.experimental import pallas as pl
from jax.experimental.pallas import tpu as pltpu

SELU_ALPHA = 1.6732632423543772
SELU_SCALE = 1.0507009873554805
BN_EPS = 1e-5


def _round_up(x, m):
    return (x + m - 1) // m * m


# ----------------------------- Pallas kernel ------------------------------- #

def _gat_kernel(x_ref, w_att_ref, w_pwa_ref, w_pna_ref, vec_ref, o_ref):
    # x_ref   : (TB, n, DP)  bf16   -- TB batch elements, feature dim padded to 128
    # w_*_ref : (DP, DO)     bf16   -- padded weight matrices (already transposed)
    # vec_ref : (8, DO)      f32    -- rows 0..3: b_att, att_w/temp, BN scale, BN shift
    # o_ref   : (TB, n, DO)  f32
    tb, n, dp = x_ref.shape
    do = o_ref.shape[-1]
    m_rows = tb * n

    xb = x_ref[...]                                    # (TB, n, DP) bf16
    b_att = vec_ref[0:1, :]                            # (1, DO) f32
    aw = vec_ref[1:2, :]                               # (1, DO)  att_weight / temp
    scale = vec_ref[2:3, :]                            # (1, DO)  folded BN scale
    shift = vec_ref[3:4, :]                            # (1, DO)  folded bias + BN shift

    # ---- attention logits: ONE big MXU matmul over every (query, key) pair ---- #
    pair = (xb[:, :, None, :] * xb[:, None, :, :]).reshape(tb * n * n, dp)   # bf16
    s = jnp.tanh(jnp.dot(pair, w_att_ref[...],
                         preferred_element_type=jnp.float32) + b_att)        # (TB*n*n, DO) f32
    logits = jnp.sum(s * aw, axis=-1).reshape(m_rows, n)   # (TB*n, n), keys on lanes

    # ---- softmax over keys (lane axis) ---- #
    logits = logits - jnp.max(logits, axis=-1, keepdims=True)
    p = jnp.exp(logits)
    att = p / jnp.sum(p, axis=-1, keepdims=True)            # (TB*n, n) f32

    # ---- attention-weighted node features: batched (n,n)@(n,DP) on the MXU ---- #
    ax = jnp.einsum("bij,bjd->bid",
                    att.reshape(tb, n, n).astype(xb.dtype), xb,
                    preferred_element_type=jnp.float32)      # (TB, n, DP) f32

    # ---- projections + folded bias/BatchNorm(eval) + SELU, all fused ---- #
    x1 = jnp.dot(ax.reshape(m_rows, dp).astype(xb.dtype), w_pwa_ref[...],
                 preferred_element_type=jnp.float32)
    x2 = jnp.dot(xb.reshape(m_rows, dp), w_pna_ref[...],
                 preferred_element_type=jnp.float32)
    y = (x1 + x2) * scale + shift
    neg = SELU_ALPHA * (jnp.exp(jnp.minimum(y, 0.0)) - 1.0)   # clamp: no inf intermediates
    o_ref[...] = (SELU_SCALE * jnp.where(y > 0, y, neg)).reshape(tb, n, do)


# ------------------------------ batch tiling -------------------------------- #

def _choose_batch_tile(bs, n, dp, do, vmem_budget=40 << 20):
    """Largest per-step batch tile that (a) fits a v7x-safe VMEM budget and
    (b) once the MXU M dim is filled (>= 256 rows) prefers more grid steps so
    both v7x TensorCores get work."""
    def vmem_bytes(tb):
        pair = tb * n * n * dp * 2               # bf16 pairwise slab
        tanh = tb * n * n * do * 4               # f32 tanh/logits slab
        axb = tb * n * dp * 4                    # f32 attention-weighted features
        io = 2 * tb * n * dp * 2 + 2 * tb * n * do * 4   # double-buffered x / out
        return pair + tanh + axb + io

    fitting = [t for t in range(1, bs + 1)
               if bs % t == 0 and vmem_bytes(t) <= vmem_budget]
    if not fitting:
        return 1
    for t in fitting:                            # ascending: smallest tile that fills the MXU
        if t * n >= 256:
            return t
    return fitting[-1]                           # otherwise the biggest that fits


# ------------------------------ wrapper ------------------------------------- #

@functools.partial(jax.jit, static_argnames=("temp",))
def graph_attention_forward(x, params, temp=1.0):
    """x: (bs, n, d_in) float32 -> (bs, n, d_out) float32."""
    bs, n, d_in = x.shape
    d_out = params["w_att"].shape[0]
    f32, bf16 = jnp.float32, jnp.bfloat16
    dp = _round_up(d_in, 128)                    # lane-dense padded feature dims
    do = _round_up(d_out, 128)

    def pad_w(w):                                # torch (out,in) -> (DP, DO) bf16
        wt = jnp.pad(w.astype(f32).T, ((0, dp - d_in), (0, do - d_out)))
        return wt.astype(bf16)

    def pad_v(v):
        return jnp.pad(v.astype(f32), (0, do - d_out))

    x_p = jnp.pad(x.astype(f32), ((0, 0), (0, 0), (0, dp - d_in))).astype(bf16)
    w_att = pad_w(params["w_att"])
    w_pwa = pad_w(params["w_pwa"])
    w_pna = pad_w(params["w_pna"])

    # fold proj biases + BatchNorm(eval) into one per-channel scale/shift pair
    scale = params["gamma"] * lax.rsqrt(params["rvar"] + BN_EPS)
    shift = params["beta"] + (params["b_pwa"] + params["b_pna"]
                              - params["rmean"]) * scale
    vec = jnp.zeros((8, do), f32)
    vec = vec.at[0].set(pad_v(params["b_att"]))
    vec = vec.at[1].set(pad_v(params["att_w"][:, 0] / temp))
    vec = vec.at[2].set(pad_v(scale))
    vec = vec.at[3].set(pad_v(shift))

    tb = _choose_batch_tile(bs, n, dp, do)
    grid = (bs // tb,)

    cost = pl.CostEstimate(
        flops=(bs * n * n * dp + 2 * bs * n * n * dp * do + 3 * bs * n * n * do
               + 2 * bs * n * n * dp + 4 * bs * n * dp * do + 8 * bs * n * do),
        transcendentals=bs * n * n * do + bs * n * n + bs * n * do,
        bytes_accessed=(bs * n * dp * 2 + 3 * dp * do * 2 + 8 * do * 4
                        + bs * n * do * 4),
    )
    shared = lambda shape: pl.BlockSpec(shape, lambda b: (0,) * len(shape))

    out = pl.pallas_call(
        _gat_kernel,
        out_shape=jax.ShapeDtypeStruct((bs, n, do), f32),
        grid=grid,
        in_specs=[
            pl.BlockSpec((tb, n, dp), lambda b: (b, 0, 0)),   # x (batch tile)
            shared((dp, do)),                                 # W_att^T
            shared((dp, do)),                                 # W_proj_with_att^T
            shared((dp, do)),                                 # W_proj_without_att^T
            shared((8, do)),                                  # packed per-channel vectors
        ],
        out_specs=pl.BlockSpec((tb, n, do), lambda b: (b, 0, 0)),
        compiler_params=pltpu.CompilerParams(
            dimension_semantics=("parallel",),
            vmem_limit_bytes=64 * 1024 * 1024),
        cost_estimate=cost,
    )(x_p, w_att, w_pwa, w_pna, vec)
    return out[:, :, :d_out]


# --------------------------- reference (pure JAX) --------------------------- #

def graph_attention_ref(x, params, temp=1.0):
    pw = x[:, :, None, :] * x[:, None, :, :]                           # (bs,n,n,d_in)
    att = jnp.tanh(jnp.einsum("bijc,oc->bijo", pw, params["w_att"]) + params["b_att"])
    att = jnp.einsum("bijo,ok->bijk", att, params["att_w"])[..., 0] / temp
    att = jax.nn.softmax(att, axis=-1)        # torch softmax(dim=-2) == key axis j
    x1 = jnp.einsum("bij,bjc->bic", att, x)
    x1 = jnp.einsum("bic,oc->bio", x1, params["w_pwa"]) + params["b_pwa"]
    x2 = jnp.einsum("bic,oc->bio", x, params["w_pna"]) + params["b_pna"]
    y = x1 + x2
    inv = 1.0 / jnp.sqrt(params["rvar"] + BN_EPS)
    y = (y - params["rmean"]) * inv * params["gamma"] + params["beta"]
    return jax.nn.selu(y)


# ------------------------------- param init --------------------------------- #

def init_params(key, d_in, d_out):
    ks = jax.random.split(key, 11)
    lin = lambda k, o, i: jax.random.normal(k, (o, i), jnp.float32) / jnp.sqrt(i)
    return dict(
        w_att=lin(ks[0], d_out, d_in),
        b_att=0.1 * jax.random.normal(ks[1], (d_out,), jnp.float32),
        att_w=jax.random.normal(ks[2], (d_out, 1), jnp.float32) / jnp.sqrt(d_out),
        w_pwa=lin(ks[3], d_out, d_in),
        b_pwa=0.1 * jax.random.normal(ks[4], (d_out,), jnp.float32),
        w_pna=lin(ks[5], d_out, d_in),
        b_pna=0.1 * jax.random.normal(ks[6], (d_out,), jnp.float32),
        gamma=1.0 + 0.1 * jax.random.normal(ks[7], (d_out,), jnp.float32),
        beta=0.1 * jax.random.normal(ks[8], (d_out,), jnp.float32),
        rmean=0.1 * jax.random.normal(ks[9], (d_out,), jnp.float32),
        rvar=1.0 + 0.1 * jax.random.uniform(ks[10], (d_out,), jnp.float32),
    )


if __name__ == "__main__":
    key = jax.random.PRNGKey(0)
    kx, kp = jax.random.split(key)
    BS, N_NODES, D_IN, D_OUT = 2, 8, 16, 32
    x = jax.random.normal(kx, (BS, N_NODES, D_IN), jnp.float32)
    params = init_params(kp, D_IN, D_OUT)

    out = jax.block_until_ready(graph_attention_forward(x, params, temp=1.0))
    assert out.shape == (BS, N_NODES, D_OUT), out.shape

    ref = graph_attention_ref(x, params, temp=1.0)
    err = float(jnp.max(jnp.abs(out - ref)))
    # MXU operands are bfloat16 (per perf review); compare against the pure-f32
    # reference with a correspondingly loosened tolerance.
    assert jnp.allclose(out, ref, rtol=1e-1, atol=1e-1), err

    print("KERNEL_OK")
</pallas_src>

<mosaic_0001>
module attributes {stable_mosaic.version = 11 : i64} {
  func.func @_gat_kernel(%arg0: i32, %arg1: memref<2x8x128xbf16, #tpu.memory_space<vmem>>, %arg2: memref<128x128xbf16, #tpu.memory_space<vmem>>, %arg3: memref<128x128xbf16, #tpu.memory_space<vmem>>, %arg4: memref<128x128xbf16, #tpu.memory_space<vmem>>, %arg5: memref<8x128xf32, #tpu.memory_space<vmem>>, %arg6: memref<2x8x128xf32, #tpu.memory_space<vmem>>) attributes {dimension_semantics = [#tpu.dimension_semantics<parallel>], iteration_bounds = array<i64: 1>, scalar_prefetch = 0 : i64, scratch_operands = 0 : i64, tpu.core_type = #tpu.core_type<tc>, window_params = [{transform_indices = @transform_0, window_bounds = array<i64: 2, 8, 128>}, {pipeline_mode = #tpu.pipeline_mode<synchronous>, transform_indices = @transform_1, window_bounds = array<i64: 128, 128>}, {pipeline_mode = #tpu.pipeline_mode<synchronous>, transform_indices = @transform_2, window_bounds = array<i64: 128, 128>}, {pipeline_mode = #tpu.pipeline_mode<synchronous>, transform_indices = @transform_3, window_bounds = array<i64: 128, 128>}, {pipeline_mode = #tpu.pipeline_mode<synchronous>, transform_indices = @transform_4, window_bounds = array<i64: 8, 128>}, {transform_indices = @transform_5, window_bounds = array<i64: 2, 8, 128>}]} {
    %c0 = arith.constant 0 : index
    %c0_0 = arith.constant 0 : index
    %c0_1 = arith.constant 0 : index
    %0 = vector.load %arg1[%c0, %c0_0, %c0_1] : memref<2x8x128xbf16, #tpu.memory_space<vmem>>, vector<2x8x128xbf16>
    %c0_2 = arith.constant 0 : index
    %c0_3 = arith.constant 0 : index
    %1 = vector.load %arg5[%c0_2, %c0_3] : memref<8x128xf32, #tpu.memory_space<vmem>>, vector<1x128xf32>
    %c1 = arith.constant 1 : index
    %c0_4 = arith.constant 0 : index
    %2 = vector.load %arg5[%c1, %c0_4] : memref<8x128xf32, #tpu.memory_space<vmem>>, vector<1x128xf32>
    %c2 = arith.constant 2 : index
    %c0_5 = arith.constant 0 : index
    %3 = vector.load %arg5[%c2, %c0_5] : memref<8x128xf32, #tpu.memory_space<vmem>>, vector<1x128xf32>
    %c3 = arith.constant 3 : index
    %c0_6 = arith.constant 0 : index
    %4 = vector.load %arg5[%c3, %c0_6] : memref<8x128xf32, #tpu.memory_space<vmem>>, vector<1x128xf32>
    %5 = vector.shape_cast %0 : vector<2x8x128xbf16> to vector<2x8x1x128xbf16>
    %6 = vector.shape_cast %0 : vector<2x8x128xbf16> to vector<2x1x8x128xbf16>
    %7 = vector.broadcast %5 : vector<2x8x1x128xbf16> to vector<2x8x8x128xbf16>
    %8 = vector.broadcast %6 : vector<2x1x8x128xbf16> to vector<2x8x8x128xbf16>
    %9 = arith.mulf %7, %8 : vector<2x8x8x128xbf16>
    %10 = vector.shape_cast %9 : vector<2x8x8x128xbf16> to vector<128x128xbf16>
    %c0_7 = arith.constant 0 : index
    %c0_8 = arith.constant 0 : index
    %11 = vector.load %arg2[%c0_7, %c0_8] : memref<128x128xbf16, #tpu.memory_space<vmem>>, vector<128x128xbf16>
    %cst = arith.constant dense<0.000000e+00> : vector<128x128xf32>
    %12 = tpu.matmul %10, %11, %cst {dimension_numbers = #tpu.dot_dimension_numbers<[1], [0], [0], [1], [0, 0, 1, 1], [], []>} : vector<128x128xbf16>, vector<128x128xbf16>, vector<128x128xf32> -> vector<128x128xf32>
    %13 = vector.broadcast %1 : vector<1x128xf32> to vector<128x128xf32>
    %14 = arith.addf %12, %13 : vector<128x128xf32>
    %15 = math.tanh %14 : vector<128x128xf32>
    %16 = vector.broadcast %2 : vector<1x128xf32> to vector<128x128xf32>
    %17 = arith.mulf %15, %16 : vector<128x128xf32>
    %cst_9 = arith.constant dense<0.000000e+00> : vector<128xf32>
    %18 = vector.multi_reduction <add>, %17, %cst_9 [1] : vector<128x128xf32> to vector<128xf32>
    %19 = vector.shape_cast %18 : vector<128xf32> to vector<16x8xf32>
    %cst_10 = arith.constant dense<0xFF800000> : vector<16xf32>
    %20 = vector.multi_reduction <maximumf>, %19, %cst_10 [1] : vector<16x8xf32> to vector<16xf32>
    %21 = vector.shape_cast %20 : vector<16xf32> to vector<16x1xf32>
    %22 = vector.broadcast %21 : vector<16x1xf32> to vector<16x8xf32>
    %23 = arith.subf %19, %22 : vector<16x8xf32>
    %24 = math.exp %23 : vector<16x8xf32>
    %cst_11 = arith.constant dense<0.000000e+00> : vector<16xf32>
    %25 = vector.multi_reduction <add>, %24, %cst_11 [1] : vector<16x8xf32> to vector<16xf32>
    %26 = vector.shape_cast %25 : vector<16xf32> to vector<16x1xf32>
    %27 = vector.broadcast %26 : vector<16x1xf32> to vector<16x8xf32>
    %28 = arith.divf %24, %27 : vector<16x8xf32>
    %29 = vector.shape_cast %28 : vector<16x8xf32> to vector<2x8x8xf32>
    %30 = arith.truncf %29 : vector<2x8x8xf32> to vector<2x8x8xbf16>
    "tpu.trace_start"() <{level = 10 : i32, message = "bij,bjd->bid"}> : () -> ()
    %cst_12 = arith.constant dense<0.000000e+00> : vector<2x8x128xf32>
    %31 = tpu.matmul %30, %0, %cst_12 {dimension_numbers = #tpu.dot_dimension_numbers<[2], [1], [1], [2], [0, 0, 0, 1, 1, 2], [0], [0]>} : vector<2x8x8xbf16>, vector<2x8x128xbf16>, vector<2x8x128xf32> -> vector<2x8x128xf32>
    "tpu.trace_stop"() : () -> ()
    %32 = vector.shape_cast %31 : vector<2x8x128xf32> to vector<16x128xf32>
    %33 = arith.truncf %32 : vector<16x128xf32> to vector<16x128xbf16>
    %c0_13 = arith.constant 0 : index
    %c0_14 = arith.constant 0 : index
    %34 = vector.load %arg3[%c0_13, %c0_14] : memref<128x128xbf16, #tpu.memory_space<vmem>>, vector<128x128xbf16>
    %cst_15 = arith.constant dense<0.000000e+00> : vector<16x128xf32>
    %35 = tpu.matmul %33, %34, %cst_15 {dimension_numbers = #tpu.dot_dimension_numbers<[1], [0], [0], [1], [0, 0, 1, 1], [], []>} : vector<16x128xbf16>, vector<128x128xbf16>, vector<16x128xf32> -> vector<16x128xf32>
    %36 = vector.shape_cast %0 : vector<2x8x128xbf16> to vector<16x128xbf16>
    %c0_16 = arith.constant 0 : index
    %c0_17 = arith.constant 0 : index
    %37 = vector.load %arg4[%c0_16, %c0_17] : memref<128x128xbf16, #tpu.memory_space<vmem>>, vector<128x128xbf16>
    %cst_18 = arith.constant dense<0.000000e+00> : vector<16x128xf32>
    %38 = tpu.matmul %36, %37, %cst_18 {dimension_numbers = #tpu.dot_dimension_numbers<[1], [0], [0], [1], [0, 0, 1, 1], [], []>} : vector<16x128xbf16>, vector<128x128xbf16>, vector<16x128xf32> -> vector<16x128xf32>
    %39 = arith.addf %35, %38 : vector<16x128xf32>
    %40 = vector.broadcast %3 : vector<1x128xf32> to vector<16x128xf32>
    %41 = arith.mulf %39, %40 : vector<16x128xf32>
    %42 = vector.broadcast %4 : vector<1x128xf32> to vector<16x128xf32>
    %43 = arith.addf %41, %42 : vector<16x128xf32>
    %cst_19 = arith.constant 0.000000e+00 : f32
    %44 = vector.broadcast %cst_19 : f32 to vector<16x128xf32>
    %45 = arith.minimumf %43, %44 : vector<16x128xf32>
    %46 = math.exp %45 : vector<16x128xf32>
    %cst_20 = arith.constant 1.000000e+00 : f32
    %47 = vector.broadcast %cst_20 : f32 to vector<16x128xf32>
    %48 = arith.subf %46, %47 : vector<16x128xf32>
    %cst_21 = arith.constant 1.67326319 : f32
    %49 = vector.broadcast %cst_21 : f32 to vector<16x128xf32>
    %50 = arith.mulf %49, %48 : vector<16x128xf32>
    %cst_22 = arith.constant 0.000000e+00 : f32
    %51 = vector.broadcast %cst_22 : f32 to vector<16x128xf32>
    %52 = arith.cmpf ogt, %43, %51 : vector<16x128xf32>
    %53 = arith.select %52, %43, %50 : vector<16x128xi1>, vector<16x128xf32>
    %cst_23 = arith.constant 1.05070102 : f32
    %54 = vector.broadcast %cst_23 : f32 to vector<16x128xf32>
    %55 = arith.mulf %54, %53 : vector<16x128xf32>
    %56 = vector.shape_cast %55 : vector<16x128xf32> to vector<2x8x128xf32>
    %c0_24 = arith.constant 0 : index
    %c0_25 = arith.constant 0 : index
    %c0_26 = arith.constant 0 : index
    %57 = vector.load %arg6[%c0_24, %c0_25, %c0_26] : memref<2x8x128xf32, #tpu.memory_space<vmem>>, vector<2x8x128xf32>
    tpu.vector_store %arg6[%c0_24, %c0_25, %c0_26], %56 {strides = array<i32>} : memref<2x8x128xf32, #tpu.memory_space<vmem>>, vector<2x8x128xf32>,
    return
  }
  func.func @transform_0(%arg0: i32) -> (i32, i32, i32) {
    %c0_i32 = arith.constant 0 : i32
    %c0_i32_0 = arith.constant 0 : i32
    %c0_i32_1 = arith.constant 0 : i32
    return %arg0, %c0_i32, %c0_i32_0 : i32, i32, i32
  }
  func.func @transform_1(%arg0: i32) -> (i32, i32) {
    %c0_i32 = arith.constant 0 : i32
    %c0_i32_0 = arith.constant 0 : i32
    %c0_i32_1 = arith.constant 0 : i32
    return %c0_i32, %c0_i32_0 : i32, i32
  }
  func.func @transform_2(%arg0: i32) -> (i32, i32) {
    %c0_i32 = arith.constant 0 : i32
    %c0_i32_0 = arith.constant 0 : i32
    %c0_i32_1 = arith.constant 0 : i32
    return %c0_i32, %c0_i32_0 : i32, i32
  }
  func.func @transform_3(%arg0: i32) -> (i32, i32) {
    %c0_i32 = arith.constant 0 : i32
    %c0_i32_0 = arith.constant 0 : i32
    %c0_i32_1 = arith.constant 0 : i32
    return %c0_i32, %c0_i32_0 : i32, i32
  }
  func.func @transform_4(%arg0: i32) -> (i32, i32) {
    %c0_i32 = arith.constant 0 : i32
    %c0_i32_0 = arith.constant 0 : i32
    %c0_i32_1 = arith.constant 0 : i32
    return %c0_i32, %c0_i32_0 : i32, i32
  }
  func.func @transform_5(%arg0: i32) -> (i32, i32, i32) {
    %c0_i32 = arith.constant 0 : i32
    %c0_i32_0 = arith.constant 0 : i32
    %c0_i32_1 = arith.constant 0 : i32
    return %arg0, %c0_i32, %c0_i32_0 : i32, i32, i32
  }
}

</mosaic_0001>

<bundles_post_ra>
// kernel: graph_attention_forward.1
= control target key start
LH: loop header
LB: loop body
LE: loop exit
PB: predicated region body
PF: predicated region fallthrough
CT: control target
= control target key end

     0   :  { %10 = vsyncpa [#allocation3], 0  ;;  %s2692_s0 = inlined_call_operand.hbm [shape: bf16[2,8,128], index: 0, kind: input, shape index: {}]   ;;  %s2693_s1 = inlined_call_operand.hbm [shape: bf16[128,128], index: 1, kind: input, shape index: {}]   ;;  %s2694_s2 = inlined_call_operand.hbm [shape: bf16[128,128], index: 2, kind: input, shape index: {}]   ;;  %s2695_s3 = inlined_call_operand.hbm [shape: bf16[128,128], index: 3, kind: input, shape index: {}]   ;;  %s2696_s4 = inlined_call_operand.hbm [shape: f32[8,128], index: 4, kind: input, shape index: {}]   ;;  %s2697_s5 = inlined_call_operand.hbm [shape: f32[2,8,128], index: 5, kind: output, shape index: {}]  }
   0x1   :  { %11 = vsyncpa [#allocation6], 0 }
   0x2   :  { %12 = vsyncpa [#allocation9], 0 }
   0x3   :  { %13 = vsyncpa [#allocation4], 0  ;;  %s2144_s18 = smov [#allocation5]   ;;  %s2145_s20 = smov [#allocation8]  }
   0x4   :  { %s31_s19 = sshll.u32 %s2144_s18, 4  ;;  %s55_s21 = sshll.u32 %s2145_s20, 4  ;;  %s32_s19 = int_to_ptr.vmem [resolvable:$true] %s31_s19  ;;  %s2188_s21 = int_to_ptr.vmem [resolvable:$true] %s55_s21 }
   0x5   :  { %s2004_s24 = scalar_lea.hbm %s2693_s1, 1024 }
   0x6   :  { %p2005_p0 = scmp.ne.s32.totalorder %s2693_s1, %s2004_s24  ;;  %p2008_p1 = scmp.lt.u32.totalorder %s2004_s24, %s2693_s1 }
   0x8   :  { %p2010_p2 = pnand %p2008_p1, %p2005_p0 }
   0xa   :  { %2013 = shalt.err (!%p2010_p2)
}
   0xb   :  { %s2014_s29 = scalar_lea.vmem %s32_s19, 1024  ;;  %p2019_p4 = scmp.lt.s32.totalorder %s32_s19, %s32_s19 }
   0xc   :  { %p2015_p3 = scmp.ne.s32.totalorder %s32_s19, %s2014_s29  ;;  %p2020_p5 = scmp.lt.s32.totalorder %s2014_s29, %s2014_s29 }
   0xe   :  { %p2021_p6 = por %p2020_p5, %p2019_p4 }
  0x10   :  { %p2022_p7 = pnand %p2021_p6, %p2015_p3 }
  0x12   :  { %2025 = shalt.err (!%p2022_p7)
}
  0x13   :  { %s2146_s30 = smov 64   ;;  %s2147_s6 = smov 4  }
  0x14   :  { %37 = dma.hbm_to_vmem [thread:$0]  %s2693_s1, 1024, %s32_s19, [#allocation6], %s2146_s30, %s2146_s30, %s2147_s6  }
  0x15   :  { %s2026_s11 = scalar_lea.hbm %s2695_s3, 1024 }
  0x16   :  { %p2027_p8 = scmp.ne.s32.totalorder %s2695_s3, %s2026_s11  ;;  %p2030_p9 = scmp.lt.u32.totalorder %s2026_s11, %s2695_s3 }
  0x18   :  { %p2032_p10 = pnand %p2030_p9, %p2027_p8 }
  0x1a   :  { %2035 = shalt.err (!%p2032_p10)
}
  0x1b   :  { %s2036_s16 = scalar_lea.vmem %s2188_s21, 1024  ;;  %p2041_p12 = scmp.lt.s32.totalorder %s2188_s21, %s2188_s21 }
  0x1c   :  { %p2037_p11 = scmp.ne.s32.totalorder %s2188_s21, %s2036_s16  ;;  %p2042_p13 = scmp.lt.s32.totalorder %s2036_s16, %s2036_s16 }
  0x1e   :  { %p2043_p0 = por %p2042_p13, %p2041_p12 }
  0x20   :  { %p2044_p1 = pnand %p2043_p0, %p2037_p11 }
  0x22   :  { %2047 = shalt.err (!%p2044_p1)
}
  0x23   :  { %61 = dma.hbm_to_vmem [thread:$0]  %s2695_s3, 1024, %s2188_s21, [#allocation9], %s2146_s30, %s2146_s30, %s2147_s6  }
  0x24   :  { %s2148_s18 = smov [#allocation2]   ;;  %s2149_s20 = smov [#allocation7]  }
  0x25   :  { %s19_s19 = sshll.u32 %s2148_s18, 4  ;;  %s43_s22 = sshll.u32 %s2149_s20, 4  ;;  %s20_s19 = int_to_ptr.vmem [resolvable:$true] %s19_s19  ;;  %s2225_s22 = int_to_ptr.vmem [resolvable:$true] %s43_s22 }
  0x26   :  { %s2048_s25 = scalar_lea.hbm %s2692_s0, 128 }
  0x27   :  { %p2049_p2 = scmp.ne.s32.totalorder %s2692_s0, %s2048_s25  ;;  %p2052_p3 = scmp.lt.u32.totalorder %s2048_s25, %s2692_s0 }
  0x29   :  { %p2054_p4 = pnand %p2052_p3, %p2049_p2 }
  0x2b   :  { %2057 = shalt.err (!%p2054_p4)
}
  0x2c   :  { %s2058_s3 = scalar_lea.vmem %s20_s19, 128  ;;  %p2063_p6 = scmp.lt.s32.totalorder %s20_s19, %s20_s19 }
  0x2d   :  { %p2059_p5 = scmp.ne.s32.totalorder %s20_s19, %s2058_s3  ;;  %p2064_p7 = scmp.lt.s32.totalorder %s2058_s3, %s2058_s3 }
  0x2f   :  { %p2065_p8 = por %p2064_p7, %p2063_p6 }
  0x31   :  { %p2066_p9 = pnand %p2065_p8, %p2059_p5 }
  0x33   :  { %2069 = shalt.err (!%p2066_p9)
}
  0x34   :  { %25 = dma.hbm_to_vmem [thread:$0]  %s2692_s0, 128, %s20_s19, [#allocation3], %s2146_s30, %s2146_s30, %s2147_s6  }
  0x35   :  { %s2070_s10 = scalar_lea.hbm %s2694_s2, 1024 }
  0x36   :  { %p2071_p10 = scmp.ne.s32.totalorder %s2694_s2, %s2070_s10  ;;  %p2074_p11 = scmp.lt.u32.totalorder %s2070_s10, %s2694_s2 }
  0x38   :  { %p2076_p12 = pnand %p2074_p11, %p2071_p10 }
  0x3a   :  { %2079 = shalt.err (!%p2076_p12)
}
  0x3b   :  { %s2080_s15 = scalar_lea.vmem %s2225_s22, 1024  ;;  %p2085_p0 = scmp.lt.s32.totalorder %s2225_s22, %s2225_s22 }
  0x3c   :  { %p2081_p13 = scmp.ne.s32.totalorder %s2225_s22, %s2080_s15  ;;  %p2086_p1 = scmp.lt.s32.totalorder %s2080_s15, %s2080_s15 }
  0x3e   :  { %p2087_p2 = por %p2086_p1, %p2085_p0 }
  0x40   :  { %p2088_p3 = pnand %p2087_p2, %p2081_p13 }
  0x42   :  { %2091 = shalt.err (!%p2088_p3)
}
  0x43   :  { %49 = dma.hbm_to_vmem [thread:$0]  %s2694_s2, 1024, %s2225_s22, [#allocation6], %s2146_s30, %s2146_s30, %s2147_s6  }
  0x44   :  { %s2150_s1 = smov [#allocation10]   ;;  %s2092_s20 = scalar_lea.hbm %s2696_s4, 128 }
  0x45   :  { %s68_s17 = sshll.u32 %s2150_s1, 4  ;;  %p2093_p4 = scmp.ne.s32.totalorder %s2696_s4, %s2092_s20  ;;  %s69_s17 = int_to_ptr.vmem [resolvable:$true] %s68_s17 }
  0x46   :  { %p2096_p5 = scmp.lt.u32.totalorder %s2092_s20, %s2696_s4 }
  0x48   :  { %p2098_p6 = pnand %p2096_p5, %p2093_p4 }
  0x4a   :  { %2101 = shalt.err (!%p2098_p6)
}
  0x4b   :  { %s2102_s27 = scalar_lea.vmem %s69_s17, 128  ;;  %p2107_p8 = scmp.lt.s32.totalorder %s69_s17, %s69_s17 }
  0x4c   :  { %p2103_p7 = scmp.ne.s32.totalorder %s69_s17, %s2102_s27  ;;  %p2108_p9 = scmp.lt.s32.totalorder %s2102_s27, %s2102_s27 }
  0x4e   :  { %p2109_p10 = por %p2108_p9, %p2107_p8 }
  0x50   :  { %p2110_p11 = pnand %p2109_p10, %p2103_p7 }
  0x52   :  { %2113 = shalt.err (!%p2110_p11)
}
  0x53   :  { %71 = dma.hbm_to_vmem [thread:$0]  %s2696_s4, 128, %s69_s17, [#allocation9]  }
  0x54   :  { %2136 = dma.done.wait [#allocation3], 128  }
  0x55   :  { %2137 = vsyncadd [#allocation3], 4294967168 }
  0x56   :  { %2138 = dma.done.wait [#allocation6], 2048  }
  0x57   :  { %2139 = vsyncadd [#allocation6], 4294965248 }
  0x58   :  { %2140 = dma.done.wait [#allocation9], 1152  }
  0x59   :  { %2141 = vsyncadd [#allocation9], 4294966144  ;;  %v2151_v0 = vmov 1966171168   ;;  %v99_v2 = vlaneseq  ;;  %v1877_v3 = vld [vmem:[#allocation5] sm:$0xff]   ;;  %v1878_v4 = vld [vmem:[#allocation5 + $0x8] sm:$0xff]  }
  0x5a   :  { %v97_v1 = vunpack.c.l.s4 %v2151_v0  ;;  %1775 = vmatprep.subr.bf16.mxu0 %v1877_v3  ;;  %v1879_v7 = vld [vmem:[#allocation5 + $0x10] sm:$0xff]   ;;  %v1880_v9 = vld [vmem:[#allocation5 + $0x18] sm:$0xff]   ;;  %v1881_v15 = vld [vmem:[#allocation5 + $0x20] sm:$0xff]   ;;  %vm731_vm0 = vcmask 1041409   ;;  %vm733_vm1 = vcmask 1042434   ;;  %vm735_vm2 = vcmask 1043459  }
  0x5b   :  { %v2275_v6 = vshrl.u32 %v99_v2, 7  ;;  %1776 = vmatpush3.bf16.msra.mxu0 %v1877_v3  ;;  %v2281_v11 = vld [vmem:[#allocation2] sm:$0xf]  ;;  %v2283_v12 = vld [vmem:[#allocation2 + $0x4] sm:$0xf]  ;;  %v1882_v23 = vld [vmem:[#allocation5 + $0x28] sm:$0xff]  }
  0x5c   :  { %v98_v5 = vunpack.c.0.s8 %v97_v1  ;;  %1777 = vmatprep.subr.bf16.mxu0 %v1878_v4  ;;  %v1883_v47 = vld [vmem:[#allocation5 + $0x30] sm:$0xff]   ;;  %v1884_v0 = vld [vmem:[#allocation5 + $0x38] sm:$0xff]   ;;  %vm737_vm3 = vcmask 1044484   ;;  %vm739_vm4 = vcmask 1045509   ;;  %vm741_vm5 = vcmask 1046534   ;;  %s2155_s4 = smov [#allocation11]  }
  0x5d   :  { %v2279_v10 = vsub.s32 0, %v2275_v6  ;;  %vm743_vm6 = vcmask 1047559   ;;  %vm754_vm7 = vcmask 64512   ;;  %vm1254_vm8 = vcmask 1043456   ;;  %s1674_s6 = sshll.u32 %s2155_s4, 4  ;;  %s1675_s6 = int_to_ptr.vmem [resolvable:$true] %s1674_s6 }
  0x5e   :  { %v101_v8 = vsub.s32 %v98_v5, %v2275_v6  ;;  %vm2154_vm9 = vmmov 0   ;;  %s2114_s22 = scalar_lea.vmem %s1675_s6, 256  ;;  %p2119_p13 = scmp.lt.s32.totalorder %s1675_s6, %s1675_s6 }
  0x5f   :  { %1778 = vmatpush3.bf16.msra.mxu0 %v1878_v4  ;;  %p2115_p12 = scmp.ne.s32.totalorder %s1675_s6, %s2114_s22  ;;  %p2120_p0 = scmp.lt.s32.totalorder %s2114_s22, %s2114_s22 }
  0x60   :  { %1779 = vmatprep.subr.bf16.mxu0 %v1879_v7  ;;  %v102_v13 = vrot.slane %v2281_v11, %v101_v8  ;;  %v126_v14 = vrot.slane %v2283_v12, %v101_v8 }
  0x61   :  { %p2121_p1 = por %p2120_p0, %p2119_p13 }
  0x62   :  { %v103_v16 = vcombine.high %v102_v13, %v102_v13  ;;  %v110_v17 = vrot.slane %v102_v13, %v101_v8  ;;  %v134_v18 = vrot.slane %v126_v14, %v101_v8  ;;  %v127_v26 = vcombine.high %v126_v14, %v126_v14 }
  0x63   :  { %1780 = vmatpush3.bf16.msra.mxu0 %v1879_v7  ;;  %p2122_p2 = pnand %p2121_p1, %p2115_p12 }
  0x64   :  { %1781 = vmatprep.subr.bf16.mxu0 %v1880_v9  ;;  %v145_v19 = vunpack.i.h.s16 %v110_v17  ;;  %v1688_v20 = vpack.i.b16 %v110_v17, %v110_v17  ;;  %v117_v21 = vrot.slane %v103_v16, %v101_v8  ;;  %v118_v22 = vcombine.high %v110_v17, %v110_v17 }
  0x65   :  { %v153_v24 = vunpack.i.h.s16 %v134_v18  ;;  %v1692_v25 = vpack.i.b16 %v134_v18, %v134_v18  ;;  %v141_v58 = vrot.slane %v127_v26, %v101_v8  ;;  %v142_v59 = vcombine.high %v134_v18, %v134_v18 }
  0x66   :  { %v161_v27 = vpack.i.b16 %v145_v19, %v145_v19  ;;  %v179_v28 = vrot.slane %v1688_v20, %v2279_v10  ;;  %v147_v29 = vunpack.i.h.s16 %v117_v21  ;;  %v1689_v30 = vpack.i.b16 %v117_v21, %v117_v21 }
  0x67   :  { %1782 = vmatpush3.bf16.msra.mxu0 %v1880_v9  ;;  %v149_v31 = vunpack.i.h.s16 %v118_v22  ;;  %v1690_v32 = vpack.i.b16 %v118_v22, %v118_v22  ;;  %v119_v33 = vcombine.high %v117_v21, %v117_v21  ;;  %v169_v34 = vpack.i.b16 %v153_v24, %v153_v24 }
  0x68   :  { %1783 = vmatprep.subr.bf16.mxu0 %v1881_v15  ;;  %v183_v35 = vrot.slane %v161_v27, %v2279_v10  ;;  %v241_v36 = vpack.i.b16 %v179_v28, %v179_v28  ;;  %v163_v37 = vpack.i.b16 %v147_v29, %v147_v29  ;;  %v187_v38 = vrot.slane %v1689_v30, %v2279_v10 }
  0x69   :  { %v165_v39 = vpack.i.b16 %v149_v31, %v149_v31  ;;  %v195_v40 = vrot.slane %v1690_v32, %v2279_v10  ;;  %v151_v41 = vunpack.i.h.s16 %v119_v33  ;;  %v1691_v42 = vpack.i.b16 %v119_v33, %v119_v33 }
  0x6a   :  { %v246_v43 = vrot.slane %v241_v36, %v2279_v10  ;;  %v248_v44 = vpack.i.b16 %v183_v35, %v183_v35  ;;  %v191_v45 = vrot.slane %v163_v37, %v2279_v10  ;;  %v255_v46 = vpack.i.b16 %v187_v38, %v187_v38 }
  0x6b   :  { %1784 = vmatpush3.bf16.msra.mxu0 %v1881_v15  ;;  %v199_v48 = vrot.slane %v165_v39, %v2279_v10  ;;  %v269_v49 = vpack.i.b16 %v195_v40, %v195_v40  ;;  %v167_v50 = vpack.i.b16 %v151_v41, %v151_v41  ;;  %v203_v51 = vrot.slane %v1691_v42, %v2279_v10 }
  0x6c   :  { %1785 = vmatprep.subr.bf16.mxu0 %v1882_v23  ;;  %v253_v52 = vrot.slane %v248_v44, %v2279_v10  ;;  %v352_v53 = vmul.bf16 %v246_v43, %v2281_v11  ;;  %v260_v54 = vrot.slane %v255_v46, %v2279_v10  ;;  %v262_v55 = vpack.i.b16 %v191_v45, %v191_v45 }
  0x6d   :  { %v276_v56 = vpack.i.b16 %v199_v48, %v199_v48  ;;  %v207_v57 = vrot.slane %v167_v50, %v2279_v10  ;;  %v274_v62 = vrot.slane %v269_v49, %v2279_v10  ;;  %v211_v63 = vrot.slane %v1692_v25, %v2279_v10 }
  0x6e   :  { %v353_v60 = vmul.bf16 %v253_v52, %v2281_v11  ;;  %v267_v61 = vrot.slane %v262_v55, %v2279_v10  ;;  %v354_v1 = vmul.bf16 %v260_v54, %v2281_v11  ;;  %v283_v4 = vpack.i.b16 %v203_v51, %v203_v51 }
  0x6f   :  { %1786 = vmatpush3.bf16.msra.mxu0 %v1882_v23  ;;  %v281_v3 = vrot.slane %v276_v56, %v2279_v10  ;;  %v290_v8 = vpack.i.b16 %v207_v57, %v207_v57  ;;  %v215_v9 = vrot.slane %v169_v34, %v2279_v10  ;;  %v297_v13 = vpack.i.b16 %v211_v63, %v211_v63 }
  0x70   :  { %1787 = vmatprep.subr.bf16.mxu0 %v1883_v47  ;;  %v1697_v5 = vcombine.low %v352_v53, %v353_v60  ;;  %v355_v7 = vmul.bf16 %v267_v61, %v2281_v11  ;;  %v155_v14 = vunpack.i.h.s16 %v141_v58  ;;  %v356_v15 = vmul.bf16 %v274_v62, %v2281_v11 }
  0x71   :  { %v357_v16 = vmul.bf16 %v281_v3, %v2281_v11  ;;  %v304_v17 = vpack.i.b16 %v215_v9, %v215_v9  ;;  %v157_v18 = vunpack.i.h.s16 %v142_v59  ;;  %v288_v19 = vrot.slane %v283_v4, %v2279_v10 }
  0x72   :  { %1791 = vmatprep.mubr.bf16.mxu0 %v1697_v5  ;;  %v1693_v20 = vpack.i.b16 %v141_v58, %v141_v58  ;;  %v171_v21 = vpack.i.b16 %v155_v14, %v155_v14  ;;  %v1698_v22 = vcombine.low %v354_v1, %v355_v7  ;;  %v295_v23 = vrot.slane %v290_v8, %v2279_v10  ;;  %v2335_v1 = vld [vmem:[#allocation10] ss:$0 sm:$0xff] }
  0x73   :  { %1788 = vmatpush3.bf16.msra.mxu0 %v1883_v47  ;;  %v1694_v24 = vpack.i.b16 %v142_v59, %v142_v59  ;;  %v173_v25 = vpack.i.b16 %v157_v18, %v157_v18  ;;  %v302_v26 = vrot.slane %v297_v13, %v2279_v10  ;;  %v143_v29 = vcombine.high %v141_v58, %v141_v58 }
  0x74   :  { %1789 = vmatprep.subr.bf16.mxu0 %v1884_v0  ;;  %v219_v27 = vrot.slane %v1693_v20, %v2279_v10  ;;  %v223_v28 = vrot.slane %v171_v21, %v2279_v10  ;;  %v1699_v30 = vcombine.low %v356_v15, %v357_v16  ;;  %v309_v31 = vrot.slane %v304_v17, %v2279_v10  ;;  %v2344_v21 = vld [vmem:[#allocation10 + $0x1] ss:$0 sm:$0xff] }
  0x75   :  { %v227_v32 = vrot.slane %v1694_v24, %v2279_v10  ;;  %v231_v33 = vrot.slane %v173_v25, %v2279_v10  ;;  %v159_v34 = vunpack.i.h.s16 %v143_v29  ;;  %v358_v35 = vmul.bf16 %v288_v19, %v2281_v11 }
  0x76   :  { %v359_v36 = vmul.bf16 %v295_v23, %v2281_v11  ;;  %v311_v37 = vpack.i.b16 %v219_v27, %v219_v27  ;;  %v318_v38 = vpack.i.b16 %v223_v28, %v223_v28  ;;  %v1695_v39 = vpack.i.b16 %v143_v29, %v143_v29 }
  0x77   :  { %1790 = vmatpush3.bf16.msra.mxu0 %v1884_v0  ;;  %v175_v40 = vpack.i.b16 %v159_v34, %v159_v34  ;;  %v360_v41 = vmul.bf16 %v302_v26, %v2283_v12  ;;  %v361_v42 = vmul.bf16 %v309_v31, %v2283_v12  ;;  %v325_v43 = vpack.i.b16 %v227_v32, %v227_v32 }
  0x78   :  { %v332_v44 = vpack.i.b16 %v231_v33, %v231_v33  ;;  %v1700_v45 = vcombine.low %v358_v35, %v359_v36  ;;  %v316_v46 = vrot.slane %v311_v37, %v2279_v10  ;;  %v323_v47 = vrot.slane %v318_v38, %v2279_v10 }
  0x79   :  { %v235_v48 = vrot.slane %v1695_v39, %v2279_v10  ;;  %v239_v11 = vrot.slane %v175_v40, %v2279_v10  ;;  %v1701_v49 = vcombine.low %v360_v41, %v361_v42  ;;  %v330_v50 = vrot.slane %v325_v43, %v2279_v10 }
  0x7a   :  { %1792 = vmatmul.mubr.bf16.vlgmr.msra.gmra.mrb[0].mxu0 %v1698_v22  ;;  %v337_v51 = vrot.slane %v332_v44, %v2279_v10  ;;  %v362_v52 = vmul.bf16 %v316_v46, %v2283_v12  ;;  %v363_v53 = vmul.bf16 %v323_v47, %v2283_v12 }
  0x7b   :  { %1795 = vmatprep.mubr.bf16.mxu0 %v1699_v30  ;;  %v339_v54 = vpack.i.b16 %v235_v48, %v235_v48  ;;  %v346_v55 = vpack.i.b16 %v239_v11, %v239_v11  ;;  %v364_v56 = vmul.bf16 %v330_v50, %v2283_v12 }
  0x7c   :  { %v365_v57 = vmul.bf16 %v337_v51, %v2283_v12  ;;  %v1702_v58 = vcombine.low %v362_v52, %v363_v53 }
  0x7d   :  { %v344_v59 = vrot.slane %v339_v54, %v2279_v10  ;;  %v351_v60 = vrot.slane %v346_v55, %v2279_v10 }
  0x7e   :  { %v1703_v61 = vcombine.low %v364_v56, %v365_v57 }
  0x7f   :  { %v366_v62 = vmul.bf16 %v344_v59, %v2283_v12  ;;  %v367_v63 = vmul.bf16 %v351_v60, %v2283_v12 }
  0x81   :  { %v1704_v0 = vcombine.low %v366_v62, %v367_v63 }
  0x82   :  { %1796 = vmatmul.mubr.bf16.gmra.mrb[4].mxu0 %v1700_v45 }
  0x83   :  { %1799 = vmatprep.mubr.bf16.mxu0 %v1701_v49 }
  0x8a   :  { %1800 = vmatmul.mubr.bf16.gmra.mrb[8].mxu0 %v1702_v58 }
  0x8b   :  { %1803 = vmatprep.mubr.bf16.mxu0 %v1703_v61 }
  0x92   :  { %1804 = vmatmul.mubr.bf16.gmra.mrb[12].mxu0 %v1704_v0 }
 0x14d   :  { %v1793_v3 = vpop.f32.mrb[0].mxu0 }
 0x14e   :  { %v527_v4 = vadd.f32 %v1793_v3, %v2335_v1  ;;  %v518_v5 = vpop.f32.mrb[1].mxu0 }
 0x14f   :  { %v519_v7 = vadd.f32 %v2335_v1, %v518_v5  ;;  %v1794_v8 = vpop.f32.mrb[2].mxu0 }
 0x150   :  { %1902 = vtanh.f32 %v527_v4  ;;  %v530_v9 = vadd.f32 %v1794_v8, %v2335_v1  ;;  %v521_v13 = vpop.f32.mrb[3].mxu0  ;;  %v666_v8 = vand.u32 127, %v99_v2 }
 0x151   :  { %1904 = vtanh.f32 %v519_v7  ;;  %v522_v14 = vadd.f32 %v2335_v1, %v521_v13 }
 0x152   :  { %1906 = vtanh.f32 %v530_v9 }
 0x153   :  { %1908 = vtanh.f32 %v522_v14  ;;  %v2377_v14 = vsub.s32 %v666_v8, %v2275_v6 }
 0x155   :  { %v1797_v12 = vpop.f32.mrb[4].mxu0 }
 0x156   :  { %v543_v15 = vadd.f32 %v1797_v12, %v2335_v1  ;;  %v534_v16 = vpop.f32.mrb[5].mxu0 }
 0x157   :  { %v535_v17 = vadd.f32 %v2335_v1, %v534_v16  ;;  %v1798_v18 = vpop.f32.mrb[6].mxu0 }
 0x158   :  { %1910 = vtanh.f32 %v543_v15  ;;  %v546_v19 = vadd.f32 %v1798_v18, %v2335_v1  ;;  %v537_v20 = vpop.f32.mrb[7].mxu0 }
 0x159   :  { %v538_v22 = vadd.f32 %v2335_v1, %v537_v20 }
 0x15a   :  { %v1903_v23 = vpop.eup %1902  ;;  %1912 = vtanh.f32 %v546_v19 }
 0x15b   :  { %v1905_v24 = vpop.eup %1904  ;;  %1914 = vtanh.f32 %v535_v17  ;;  %v603_v25 = vmul.f32 %v1903_v23, %v2344_v21 }
 0x15c   :  { %v1907_v26 = vpop.eup %1906  ;;  %1916 = vtanh.f32 %v538_v22  ;;  %v601_v27 = vmul.f32 %v1905_v24, %v2344_v21 }
 0x15d   :  { %v1909_v28 = vpop.eup %1908  ;;  %621 = vadd.xlane.f32.xlu1 %v603_v25  ;;  %v1801_v29 = vpop.f32.mrb[8].mxu0  ;;  %v604_v34 = vmul.f32 %v1907_v26, %v2344_v21 }
 0x15e   :  { %617 = vadd.xlane.f32.xlu0 %v601_v27  ;;  %v559_v30 = vadd.f32 %v1801_v29, %v2335_v1  ;;  %v550_v31 = vpop.f32.mrb[9].mxu0  ;;  %v602_v36 = vmul.f32 %v1909_v28, %v2344_v21 }
 0x15f   :  { %v551_v32 = vadd.f32 %v2335_v1, %v550_v31  ;;  %v1802_v33 = vpop.f32.mrb[10].mxu0 }
 0x160   :  { %1918 = vtanh.f32 %v559_v30  ;;  %v562_v35 = vadd.f32 %v1802_v33, %v2335_v1  ;;  %v553_v37 = vpop.f32.mrb[11].mxu0 }
 0x161   :  { %1920 = vtanh.f32 %v551_v32  ;;  %623 = vadd.xlane.f32.xlu1 %v604_v34  ;;  %v554_v38 = vadd.f32 %v2335_v1, %v553_v37 }
 0x162   :  { %v1911_v39 = vpop.eup %1910  ;;  %1922 = vtanh.f32 %v562_v35  ;;  %619 = vadd.xlane.f32.xlu0 %v602_v36 }
 0x163   :  { %1924 = vtanh.f32 %v554_v38  ;;  %v607_v40 = vmul.f32 %v1911_v39, %v2344_v21 }
 0x164   :  { %v1913_v41 = vpop.eup %1912 }
 0x165   :  { %v1915_v42 = vpop.eup %1914  ;;  %v1805_v43 = vpop.f32.mrb[12].mxu0  ;;  %v608_v44 = vmul.f32 %v1913_v41, %v2344_v21 }
 0x166   :  { %v1917_v45 = vpop.eup %1916  ;;  %v575_v46 = vadd.f32 %v1805_v43, %v2335_v1  ;;  %629 = vadd.xlane.f32.xlu0 %v607_v40  ;;  %v566_v47 = vpop.f32.mrb[13].mxu0  ;;  %v605_v51 = vmul.f32 %v1915_v42, %v2344_v21 }
 0x167   :  { %v567_v48 = vadd.f32 %v2335_v1, %v566_v47  ;;  %631 = vadd.xlane.f32.xlu1 %v608_v44  ;;  %v1806_v11 = vpop.f32.mrb[14].mxu0  ;;  %v606_v53 = vmul.f32 %v1917_v45, %v2344_v21 }
 0x168   :  { %1926 = vtanh.f32 %v575_v46  ;;  %v578_v49 = vadd.f32 %v1806_v11, %v2335_v1  ;;  %v569_v50 = vpop.f32.mrb[15].mxu0 }
 0x169   :  { %1928 = vtanh.f32 %v567_v48  ;;  %v570_v52 = vadd.f32 %v2335_v1, %v569_v50 }
 0x16a   :  { %v1919_v54 = vpop.eup %1918  ;;  %1930 = vtanh.f32 %v578_v49  ;;  %625 = vadd.xlane.f32.xlu0 %v605_v51 }
 0x16b   :  { %v1921_v55 = vpop.eup %1920  ;;  %1932 = vtanh.f32 %v570_v52  ;;  %627 = vadd.xlane.f32.xlu1 %v606_v53  ;;  %v611_v56 = vmul.f32 %v1919_v54, %v2344_v21 }
 0x16c   :  { %v1923_v57 = vpop.eup %1922  ;;  %v609_v60 = vmul.f32 %v1921_v55, %v2344_v21 }
 0x16d   :  { %v1925_v58 = vpop.eup %1924  ;;  %v612_v59 = vmul.f32 %v1923_v57, %v2344_v21 }
 0x16e   :  { %637 = vadd.xlane.f32.xlu0 %v611_v56  ;;  %v610_v61 = vmul.f32 %v1925_v58, %v2344_v21  ;;  %v2152_v58 = vmov 0  }
 0x16f   :  { %639 = vadd.xlane.f32.xlu1 %v612_v59  ;;  %1875 = vset.pattern.permute.xlu0 %v2152_v58  ;;  %v2450_v59 = vsub.s32 1, %v2275_v6 }
 0x170   :  { %1876 = vset.pattern.permute.xlu1 %v2152_v58 }
 0x172   :  { %v1927_v62 = vpop.eup %1926  ;;  %633 = vadd.xlane.f32.xlu0 %v609_v60  ;;  %v2453_v60 = vsub.s32 2, %v2275_v6 }
 0x173   :  { %v1929_v63 = vpop.eup %1928  ;;  %635 = vadd.xlane.f32.xlu1 %v610_v61  ;;  %v615_v5 = vmul.f32 %v1927_v62, %v2344_v21  ;;  %v2456_v61 = vsub.s32 3, %v2275_v6 }
 0x174   :  { %v1931_v0 = vpop.eup %1930  ;;  %v613_v1 = vmul.f32 %v1929_v63, %v2344_v21 }
 0x175   :  { %v1933_v3 = vpop.eup %1932  ;;  %v616_v7 = vmul.f32 %v1931_v0, %v2344_v21 }
 0x176   :  { %641 = vadd.xlane.f32.xlu0 %v613_v1  ;;  %v614_v4 = vmul.f32 %v1933_v3, %v2344_v21 }
 0x178   :  { %643 = vadd.xlane.f32.xlu1 %v614_v4 }
 0x17a   :  { %645 = vadd.xlane.f32.xlu0 %v615_v5  ;;  %v2464_v5 = vsub.s32 4, %v2275_v6 }
 0x17c   :  { %647 = vadd.xlane.f32.xlu1 %v616_v7 }
 0x1ea   :  { %v2372_v9 = vpop.xlane.xlu1 %621 }
 0x1eb   :  { %v2374_v13 = vpop.xlane.xlu0 %617  ;;  %v678_v19 = vrot.slane %v2372_v9, %v2377_v14 }
 0x1ec   :  { %v670_v17 = vrot.slane %v2374_v13, %v2377_v14 }
 0x1ee   :  { %v2381_v15 = vpop.xlane.xlu1 %623 }
 0x1ef   :  { %v2379_v12 = vpop.xlane.xlu0 %619  ;;  %v682_v22 = vrot.slane %v2381_v15, %v2377_v14 }
 0x1f0   :  { %v674_v16 = vrot.slane %v2379_v12, %v2377_v14 }
 0x1f2   :  { %v732_v2 = vsel %vm731_vm0, %v674_v16, %v670_v17 }
 0x1f3   :  { %v2388_v18 = vpop.xlane.xlu0 %629  ;;  %v734_v21 = vsel %vm733_vm1, %v678_v19, %v732_v2  ;;  %v2469_v2 = vsub.s32 5, %v2275_v6 }
 0x1f4   :  { %v2392_v20 = vpop.xlane.xlu1 %631  ;;  %v736_v26 = vsel %vm735_vm2, %v682_v22, %v734_v21  ;;  %v694_v28 = vrot.slane %v2388_v18, %v2377_v14 }
 0x1f5   :  { %v698_v30 = vrot.slane %v2392_v20, %v2377_v14 }
 0x1f7   :  { %v2397_v23 = vpop.xlane.xlu0 %625 }
 0x1f8   :  { %v686_v24 = vrot.slane %v2397_v23, %v2377_v14  ;;  %v2401_v25 = vpop.xlane.xlu1 %627 }
 0x1f9   :  { %v690_v27 = vrot.slane %v2401_v25, %v2377_v14 }
 0x1fa   :  { %v738_v29 = vsel %vm737_vm3, %v686_v24, %v736_v26  ;;  %v2479_v26 = vsub.s32 7, %v2275_v6 }
 0x1fb   :  { %v2411_v31 = vpop.xlane.xlu0 %637  ;;  %v740_v32 = vsel %vm739_vm4, %v690_v27, %v738_v29 }
 0x1fc   :  { %v2414_v33 = vpop.xlane.xlu1 %639  ;;  %v742_v34 = vsel %vm741_vm5, %v694_v28, %v740_v32  ;;  %v710_v38 = vrot.slane %v2411_v31, %v2377_v14 }
 0x1fd   :  { %v744_v35 = vsel %vm743_vm6, %v698_v30, %v742_v34  ;;  %v714_v41 = vrot.slane %v2414_v33, %v2377_v14 }
 0x1fe   :  { %v755_v36 = vsel %vm754_vm7, %v744_v35, -inf }
 0x1ff   :  { %756 = vmax.xlane.f32.xlu0 %v755_v36  ;;  %v2419_v37 = vpop.xlane.xlu0 %633 }
 0x200   :  { %v702_v39 = vrot.slane %v2419_v37, %v2377_v14  ;;  %v636_v40 = vpop.xlane.xlu1 %635 }
 0x201   :  { %v706_v42 = vrot.slane %v636_v40, %v2377_v14 }
 0x203   :  { %v745_v43 = vsel %vm731_vm0, %v706_v42, %v702_v39  ;;  %v2429_v44 = vpop.xlane.xlu0 %641 }
 0x204   :  { %v746_v45 = vsel %vm733_vm1, %v710_v38, %v745_v43  ;;  %v718_v46 = vrot.slane %v2429_v44, %v2377_v14 }
 0x205   :  { %v747_v47 = vsel %vm735_vm2, %v714_v41, %v746_v45  ;;  %v644_v48 = vpop.xlane.xlu1 %643 }
 0x206   :  { %v748_v11 = vsel %vm737_vm3, %v718_v46, %v747_v47  ;;  %v722_v49 = vrot.slane %v644_v48, %v2377_v14 }
 0x207   :  { %v2437_v50 = vpop.xlane.xlu0 %645 }
 0x208   :  { %v726_v51 = vrot.slane %v2437_v50, %v2377_v14  ;;  %v749_v52 = vsel %vm739_vm4, %v722_v49, %v748_v11 }
 0x209   :  { %v2442_v53 = vpop.xlane.xlu1 %647 }
 0x20a   :  { %v730_v54 = vrot.slane %v2442_v53, %v2377_v14  ;;  %v750_v55 = vsel %vm741_vm5, %v726_v51, %v749_v52 }
 0x20c   :  { %v751_v56 = vsel %vm743_vm6, %v730_v54, %v750_v55 }
 0x20d   :  { %v758_v57 = vsel %vm754_vm7, %v751_v56, -inf }
 0x20e   :  { %759 = vmax.xlane.f32.xlu1 %v758_v57 }
 0x28c   :  { %v757_v62 = vpop.xlane.xlu0 %756 }
 0x28d   :  { %v766_v63 = vrot.slane %v757_v62, %v2279_v10  ;;  %v770_v0 = vrot.slane %v757_v62, %v2450_v59  ;;  %v774_v1 = vrot.slane %v757_v62, %v2453_v60  ;;  %v778_v7 = vrot.slane %v757_v62, %v2456_v61 }
 0x28e   :  { %v782_v19 = vrot.slane %v757_v62, %v2464_v5  ;;  %v786_v22 = vrot.slane %v757_v62, %v2469_v2 }
 0x28f   :  { %v843_v3 = vsub.f32 %v2374_v13, %v766_v63  ;;  %v844_v4 = vsub.f32 %v2379_v12, %v770_v0  ;;  %v845_v8 = vsub.f32 %v2372_v9, %v774_v1  ;;  %v846_v21 = vsub.f32 %v2381_v15, %v778_v7 }
 0x290   :  { %v2474_v12 = vsub.s32 6, %v2275_v6  ;;  %v847_v24 = vsub.f32 %v2397_v23, %v782_v19  ;;  %v848_v28 = vsub.f32 %v2401_v25, %v786_v22  ;;  %v794_v6 = vrot.slane %v757_v62, %v2479_v26 }
 0x291   :  { %v859_v16 = vmul.f32 1.442695, %v843_v3  ;;  %v861_v17 = vmul.f32 1.442695, %v844_v4  ;;  %v863_v13 = vmul.f32 1.442695, %v845_v8 }
 0x292   :  { %v865_v9 = vmul.f32 1.442695, %v846_v21  ;;  %v790_v27 = vrot.slane %v757_v62, %v2474_v12  ;;  %v867_v15 = vmul.f32 1.442695, %v847_v24  ;;  %v869_v39 = vmul.f32 1.442695, %v848_v28 }
 0x293   :  { %1934 = vpow2.f32 %v859_v16  ;;  %v850_v46 = vsub.f32 %v2392_v20, %v794_v6 }
 0x294   :  { %1936 = vpow2.f32 %v861_v17  ;;  %v849_v38 = vsub.f32 %v2388_v18, %v790_v27 }
 0x295   :  { %1938 = vpow2.f32 %v863_v13 }
 0x296   :  { %1940 = vpow2.f32 %v865_v9 }
 0x297   :  { %1942 = vpow2.f32 %v867_v15 }
 0x29b   :  { %v760_v29 = vpop.xlane.xlu1 %759 }
 0x29c   :  { %v802_v30 = vrot.slane %v760_v29, %v2450_v59  ;;  %v810_v32 = vrot.slane %v760_v29, %v2456_v61  ;;  %v818_v36 = vrot.slane %v760_v29, %v2469_v2  ;;  %v826_v43 = vrot.slane %v760_v29, %v2479_v26 }
 0x29d   :  { %v2485_v34 = vpop.eup %1934  ;;  %v798_v47 = vrot.slane %v760_v29, %v2279_v10  ;;  %v806_v51 = vrot.slane %v760_v29, %v2453_v60  ;;  %v814_v55 = vrot.slane %v760_v29, %v2464_v5 }
 0x29e   :  { %v2487_v35 = vpop.eup %1936  ;;  %v852_v23 = vsub.f32 %v636_v40, %v802_v30  ;;  %908 = vperm.xlu0 %1875, %v2485_v34   ;;  %v854_v25 = vsub.f32 %v2414_v33, %v810_v32  ;;  %v856_v40 = vsub.f32 %v644_v48, %v818_v36  ;;  %v871_v33 = vmul.f32 1.442695, %v849_v38 }
 0x29f   :  { %911 = vperm.xlu1 %1876, %v2487_v35   ;;  %v2495_v42 = vpop.eup %1938  ;;  %v858_v18 = vsub.f32 %v2442_v53, %v826_v43  ;;  %v873_v48 = vmul.f32 1.442695, %v850_v46  ;;  %v851_v52 = vsub.f32 %v2419_v37, %v798_v47  ;;  %v853_v53 = vsub.f32 %v2411_v31, %v806_v51 }
 0x2a0   :  { %v877_v41 = vmul.f32 1.442695, %v852_v23  ;;  %v881_v45 = vmul.f32 1.442695, %v854_v25  ;;  %v2501_v11 = vpop.eup %1940  ;;  %v885_v49 = vmul.f32 1.442695, %v856_v40  ;;  %v822_v37 = vrot.slane %v760_v29, %v2474_v12 }
 0x2a1   :  { %v2507_v54 = vpop.eup %1942  ;;  %v889_v20 = vmul.f32 1.442695, %v858_v18  ;;  %v875_v56 = vmul.f32 1.442695, %v851_v52  ;;  %v855_v62 = vsub.f32 %v2429_v44, %v814_v55  ;;  %v879_v63 = vmul.f32 1.442695, %v853_v53 }
 0x2a2   :  { %1944 = vpow2.f32 %v877_v41  ;;  %v857_v31 = vsub.f32 %v2437_v50, %v822_v37 }
 0x2a3   :  { %914 = vperm.xlu1 %1876, %v2495_v42   ;;  %1946 = vpow2.f32 %v869_v39  ;;  %v883_v3 = vmul.f32 1.442695, %v855_v62 }
 0x2a4   :  { %1948 = vpow2.f32 %v881_v45  ;;  %v887_v44 = vmul.f32 1.442695, %v857_v31 }
 0x2a5   :  { %1950 = vpow2.f32 %v871_v33 }
 0x2a6   :  { %1952 = vpow2.f32 %v885_v49 }
 0x2a7   :  { %917 = vperm.xlu1 %1876, %v2501_v11   ;;  %1954 = vpow2.f32 %v873_v48 }
 0x2a8   :  { %1956 = vpow2.f32 %v889_v20 }
 0x2a9   :  { %1958 = vpow2.f32 %v875_v56 }
 0x2aa   :  { %1960 = vpow2.f32 %v879_v63 }
 0x2ab   :  { %920 = vperm.xlu1 %1876, %v2507_v54   ;;  %1962 = vpow2.f32 %v883_v3 }
 0x2ac   :  { %v2512_v57 = vpop.eup %1944  ;;  %1964 = vpow2.f32 %v887_v44 }
 0x2ad   :  { %v2514_v58 = vpop.eup %1946  ;;  %935 = vperm.xlu0 %1875, %v2512_v57  }
 0x2ae   :  { %v2520_v0 = vpop.eup %1948 }
 0x2af   :  { %923 = vperm.xlu1 %1876, %v2514_v58   ;;  %v2522_v1 = vpop.eup %1950 }
 0x2b0   :  { %v2527_v4 = vpop.eup %1952 }
 0x2b1   :  { %941 = vperm.xlu0 %1875, %v2520_v0   ;;  %v2529_v7 = vpop.eup %1954 }
 0x2b2   :  { %v2533_v8 = vpop.eup %1956 }
 0x2b3   :  { %926 = vperm.xlu1 %1876, %v2522_v1   ;;  %v2535_v16 = vpop.eup %1958 }
 0x2b4   :  { %v2539_v50 = vpop.eup %1960 }
 0x2b5   :  { %947 = vperm.xlu0 %1875, %v2527_v4   ;;  %v2542_v17 = vpop.eup %1962 }
 0x2b6   :  { %v2545_v19 = vpop.eup %1964 }
 0x2b7   :  { %929 = vperm.xlu1 %1876, %v2529_v7  }
 0x2b9   :  { %953 = vperm.xlu0 %1875, %v2533_v8  }
 0x2bb   :  { %932 = vperm.xlu1 %1876, %v2535_v16  }
 0x2bf   :  { %938 = vperm.xlu1 %1876, %v2539_v50  }
 0x2c3   :  { %944 = vperm.xlu1 %1876, %v2542_v17  }
 0x2c7   :  { %950 = vperm.xlu1 %1876, %v2545_v19  }
 0x31d   :  { %v909_v9 = vpop.permute.xlu0 %908 }
 0x31e   :  { %v912_v21 = vpop.permute.xlu1 %911  ;;  %v958_v29 = vrot.slane %v909_v9, %v2377_v14 }
 0x31f   :  { %v962_v28 = vrot.slane %v912_v21, %v2377_v14 }
 0x321   :  { %v1019_v6 = vsel %vm731_vm0, %v962_v28, %v958_v29 }
 0x322   :  { %v915_v13 = vpop.permute.xlu1 %914 }
 0x323   :  { %v966_v15 = vrot.slane %v915_v13, %v2377_v14 }
 0x325   :  { %v1020_v38 = vsel %vm733_vm1, %v966_v15, %v1019_v6 }
 0x326   :  { %v918_v22 = vpop.permute.xlu1 %917 }
 0x327   :  { %v970_v30 = vrot.slane %v918_v22, %v2377_v14 }
 0x329   :  { %v1021_v41 = vsel %vm735_vm2, %v970_v30, %v1020_v38 }
 0x32a   :  { %v921_v24 = vpop.permute.xlu1 %920 }
 0x32b   :  { %v974_v32 = vrot.slane %v921_v24, %v2377_v14 }
 0x32c   :  { %v936_v36 = vpop.permute.xlu0 %935 }
 0x32d   :  { %v1022_v43 = vsel %vm737_vm3, %v974_v32, %v1021_v41  ;;  %v994_v52 = vrot.slane %v936_v36, %v2377_v14 }
 0x32e   :  { %v924_v27 = vpop.permute.xlu1 %923 }
 0x32f   :  { %v978_v25 = vrot.slane %v924_v27, %v2377_v14 }
 0x330   :  { %v942_v47 = vpop.permute.xlu0 %941 }
 0x331   :  { %v1023_v45 = vsel %vm739_vm4, %v978_v25, %v1022_v43  ;;  %v1002_v62 = vrot.slane %v942_v47, %v2377_v14 }
 0x332   :  { %v927_v23 = vpop.permute.xlu1 %926 }
 0x333   :  { %v982_v39 = vrot.slane %v927_v23, %v2377_v14 }
 0x334   :  { %v948_v55 = vpop.permute.xlu0 %947 }
 0x335   :  { %v1024_v33 = vsel %vm741_vm5, %v982_v39, %v1023_v45  ;;  %v1010_v13 = vrot.slane %v948_v55, %v2377_v14 }
 0x336   :  { %v930_v40 = vpop.permute.xlu1 %929 }
 0x337   :  { %v986_v46 = vrot.slane %v930_v40, %v2377_v14 }
 0x338   :  { %v954_v44 = vpop.permute.xlu0 %953 }
 0x339   :  { %v1025_v18 = vsel %vm743_vm6, %v986_v46, %v1024_v33  ;;  %v1018_v9 = vrot.slane %v954_v44, %v2377_v14 }
 0x33a   :  { %v933_v49 = vpop.permute.xlu1 %932  ;;  %v1035_v48 = vsel %vm754_vm7, %v1025_v18, 0.0 }
 0x33b   :  { %1036 = vadd.xlane.f32.xlu1 %v1035_v48  ;;  %v990_v51 = vrot.slane %v933_v49, %v2377_v14 }
 0x33d   :  { %v1026_v56 = vsel %vm731_vm0, %v994_v52, %v990_v51 }
 0x33e   :  { %v939_v20 = vpop.permute.xlu1 %938 }
 0x33f   :  { %v998_v53 = vrot.slane %v939_v20, %v2377_v14 }
 0x341   :  { %v1027_v37 = vsel %vm733_vm1, %v998_v53, %v1026_v56 }
 0x342   :  { %v945_v63 = vpop.permute.xlu1 %944  ;;  %v1028_v3 = vsel %vm735_vm2, %v1002_v62, %v1027_v37 }
 0x343   :  { %v1006_v31 = vrot.slane %v945_v63, %v2377_v14 }
 0x345   :  { %v1029_v21 = vsel %vm737_vm3, %v1006_v31, %v1028_v3 }
 0x346   :  { %v951_v22 = vpop.permute.xlu1 %950  ;;  %v1030_v27 = vsel %vm739_vm4, %v1010_v13, %v1029_v21 }
 0x347   :  { %v1014_v24 = vrot.slane %v951_v22, %v2377_v14 }
 0x349   :  { %v1031_v28 = vsel %vm741_vm5, %v1014_v24, %v1030_v27 }
 0x34a   :  { %v1032_v29 = vsel %vm743_vm6, %v1018_v9, %v1031_v28 }
 0x34b   :  { %v1038_v15 = vsel %vm754_vm7, %v1032_v29, 0.0 }
 0x34c   :  { %1039 = vadd.xlane.f32.xlu0 %v1038_v15 }
 0x3c8   :  { %v1037_v30 = vpop.xlane.xlu1 %1036 }
 0x3c9   :  { %v1050_v32 = vrot.slane %v1037_v30, %v2450_v59  ;;  %v1046_v23 = vrot.slane %v1037_v30, %v2279_v10  ;;  %v1054_v6 = vrot.slane %v1037_v30, %v2453_v60  ;;  %v1058_v36 = vrot.slane %v1037_v30, %v2456_v61 }
 0x3ca   :  { %v1062_v25 = vrot.slane %v1037_v30, %v2464_v5  ;;  %v1066_v38 = vrot.slane %v1037_v30, %v2469_v2  ;;  %v1070_v39 = vrot.slane %v1037_v30, %v2474_v12  ;;  %v1074_v41 = vrot.slane %v1037_v30, %v2479_v26 }
 0x3cb   :  { %1966 = vrcp.f32 %v1050_v32 }
 0x3cc   :  { %1968 = vrcp.f32 %v1046_v23 }
 0x3cd   :  { %1970 = vrcp.f32 %v1054_v6 }
 0x3ce   :  { %1972 = vrcp.f32 %v1058_v36 }
 0x3cf   :  { %1974 = vrcp.f32 %v1062_v25 }
 0x3d0   :  { %1976 = vrcp.f32 %v1066_v38 }
 0x3d1   :  { %1978 = vrcp.f32 %v1070_v39 }
 0x3d2   :  { %1980 = vrcp.f32 %v1074_v41 }
 0x3d5   :  { %v1967_v43 = vpop.eup %1966 }
 0x3d6   :  { %v1969_v40 = vpop.eup %1968  ;;  %v1126_v45 = vmul.f32 %v1967_v43, %v2487_v35 }
 0x3d7   :  { %v1971_v46 = vpop.eup %1970  ;;  %v1124_v33 = vmul.f32 %v1969_v40, %v2485_v34  ;;  %v2153_v40 = vmov 0.0  }
 0x3d8   :  { %v1973_v47 = vpop.eup %1972  ;;  %v1156_v18 = vpack.c.bf16 %v1126_v45, %v1126_v45  ;;  %v1128_v49 = vmul.f32 %v1971_v46, %v2495_v42  ;;  %1807 = vmatprep.subr.bf16.mxu1 %v2153_v40  ;;  %1819 = vmatprep.subr.bf16.mxu0 %v2153_v40 }
 0x3d9   :  { %v1975_v48 = vpop.eup %1974  ;;  %v1040_v51 = vpop.xlane.xlu0 %1039  ;;  %v1155_v52 = vpack.c.bf16 %v1124_v33, %v1124_v33  ;;  %v1130_v20 = vmul.f32 %v1973_v47, %v2501_v11  ;;  %1809 = vmatprep.mubr.msk.bf16.mxu1 %vm2154_vm9, %v2153_v40  ;;  %1835 = vmatprep.mubr.msk.bf16.mxu0 %vm2154_vm9, %v2153_v40 }
 0x3da   :  { %v1977_v55 = vpop.eup %1976  ;;  %v1180_v53 = vunpack.c.l.b16 %v1156_v18  ;;  %v1157_v56 = vpack.c.bf16 %v1128_v49, %v1128_v49  ;;  %v1132_v37 = vmul.f32 %v1975_v48, %v2507_v54  ;;  %v1082_v62 = vrot.slane %v1040_v51, %v2450_v59 }
 0x3db   :  { %v1979_v35 = vpop.eup %1978  ;;  %v1179_v63 = vunpack.c.l.b16 %v1155_v52  ;;  %v1158_v31 = vpack.c.bf16 %v1130_v20, %v1130_v20  ;;  %v1134_v34 = vmul.f32 %v1977_v55, %v2514_v58  ;;  %v1078_v3 = vrot.slane %v1040_v51, %v2279_v10 }
 0x3dc   :  { %v1981_v42 = vpop.eup %1980  ;;  %1191 = vperm.xlu1 %1876, %v1180_v53   ;;  %1982 = vrcp.f32 %v1082_v62  ;;  %v1181_v44 = vunpack.c.l.b16 %v1157_v56  ;;  %v1159_v11 = vpack.c.bf16 %v1132_v37, %v1132_v37  ;;  %v1136_v13 = vmul.f32 %v1979_v35, %v2522_v1  ;;  %v1887_v56 = vld [vmem:[#allocation8 + $0x8] sm:$0xff]   ;;  %v1889_v37 = vld [vmem:[#allocation8 + $0x10] sm:$0xff]   ;;  %v1891_v62 = vld [vmem:[#allocation8 + $0x18] sm:$0xff]  }
 0x3dd   :  { %1188 = vperm.xlu0 %1875, %v1179_v63   ;;  %1984 = vrcp.f32 %v1078_v3  ;;  %v1182_v21 = vunpack.c.l.b16 %v1158_v31  ;;  %v1090_v54 = vrot.slane %v1040_v51, %v2456_v61  ;;  %v1086_v59 = vrot.slane %v1040_v51, %v2453_v60 }
 0x3de   :  { %v1160_v22 = vpack.c.bf16 %v1134_v34, %v1134_v34  ;;  %v1138_v24 = vmul.f32 %v1981_v42, %v2529_v7  ;;  %v1098_v58 = vrot.slane %v1040_v51, %v2469_v2  ;;  %v1094_v10 = vrot.slane %v1040_v51, %v2464_v5 }
 0x3df   :  { %1986 = vrcp.f32 %v1090_v54  ;;  %v1106_v9 = vrot.slane %v1040_v51, %v2479_v26  ;;  %v1102_v27 = vrot.slane %v1040_v51, %v2474_v12  ;;  %v1183_v1 = vunpack.c.l.b16 %v1159_v11 }
 0x3e0   :  { %1194 = vperm.xlu1 %1876, %v1181_v44   ;;  %1988 = vrcp.f32 %v1086_v59  ;;  %v1161_v28 = vpack.c.bf16 %v1136_v13, %v1136_v13  ;;  %v1184_v61 = vunpack.c.l.b16 %v1160_v22  ;;  %v1162_v60 = vpack.c.bf16 %v1138_v24, %v1138_v24 }
 0x3e1   :  { %1197 = vperm.xlu0 %1875, %v1182_v21   ;;  %1990 = vrcp.f32 %v1098_v58 }
 0x3e2   :  { %1992 = vrcp.f32 %v1094_v10  ;;  %v1185_v5 = vunpack.c.l.b16 %v1161_v28  ;;  %v1186_v29 = vunpack.c.l.b16 %v1162_v60 }
 0x3e3   :  { %1994 = vrcp.f32 %v1106_v9 }
 0x3e4   :  { %1200 = vperm.xlu1 %1876, %v1183_v1   ;;  %1996 = vrcp.f32 %v1102_v27 }
 0x3e5   :  { %1203 = vperm.xlu0 %1875, %v1184_v61  }
 0x3e6   :  { %v1983_v2 = vpop.eup %1982 }
 0x3e7   :  { %v1985_v7 = vpop.eup %1984  ;;  %v1142_v26 = vmul.f32 %v1983_v2, %v2512_v57 }
 0x3e8   :  { %1206 = vperm.xlu1 %1876, %v1185_v5   ;;  %v1140_v15 = vmul.f32 %v1985_v7, %v2535_v16  ;;  %v2610_v16 = vld [vmem:[#allocation2] sm:$0xf]  ;;  %v2642_v7 = vld [vmem:[#allocation2 + $0x4] sm:$0xf] }
 0x3e9   :  { %1209 = vperm.xlu0 %1875, %v1186_v29   ;;  %v1164_v12 = vpack.c.bf16 %v1142_v26, %v1142_v26  ;;  %v1987_v30 = vpop.eup %1986  ;;  %v1256_v45 = vsel %vm1254_vm8, %v2610_v16, 0  ;;  %v1382_v29 = vsel %vm1254_vm8, %v2642_v7, 0 }
 0x3ea   :  { %v1163_v32 = vpack.c.bf16 %v1140_v15, %v1140_v15  ;;  %v1989_v23 = vpop.eup %1988  ;;  %v1146_v36 = vmul.f32 %v1987_v30, %v2520_v0  ;;  %1808 = vmatpush3.bf16.msra.mxu1 %v1256_v45 }
 0x3eb   :  { %v1307_v6 = vunpack.c.l.b16 %v1164_v12  ;;  %v1991_v25 = vpop.eup %1990  ;;  %v1144_v39 = vmul.f32 %v1989_v23, %v2539_v50  ;;  %1813 = vmatprep.subr.bf16.mxu1 %v2153_v40 }
 0x3ec   :  { %v1306_v38 = vunpack.c.l.b16 %v1163_v32  ;;  %v1993_v41 = vpop.eup %1992  ;;  %v1166_v43 = vpack.c.bf16 %v1146_v36, %v1146_v36  ;;  %v1150_v57 = vmul.f32 %v1991_v25, %v2527_v4 }
 0x3ed   :  { %1318 = vperm.xlu0 %1875, %v1307_v6   ;;  %v1995_v46 = vpop.eup %1994  ;;  %v1165_v0 = vpack.c.bf16 %v1144_v39, %v1144_v39  ;;  %v1148_v33 = vmul.f32 %v1993_v41, %v2542_v17 }
 0x3ee   :  { %1315 = vperm.xlu1 %1876, %v1306_v38   ;;  %v1997_v50 = vpop.eup %1996  ;;  %v1309_v47 = vunpack.c.l.b16 %v1166_v43  ;;  %v1168_v18 = vpack.c.bf16 %v1150_v57, %v1150_v57  ;;  %v1154_v49 = vmul.f32 %v1995_v46, %v2533_v8 }
 0x3ef   :  { %v1308_v4 = vunpack.c.l.b16 %v1165_v0  ;;  %v1167_v48 = vpack.c.bf16 %v1148_v33, %v1148_v33  ;;  %v1152_v51 = vmul.f32 %v1997_v50, %v2545_v19  ;;  %v1885_v19 = vld [vmem:[#allocation8] sm:$0xff]  }
 0x3f0   :  { %v1311_v17 = vunpack.c.l.b16 %v1168_v18  ;;  %v1170_v52 = vpack.c.bf16 %v1154_v49, %v1154_v49  ;;  %1820 = vmatpush3.bf16.msra.mxu0 %v1885_v19  ;;  %v1897_v19 = vld [vmem:[#allocation8 + $0x30] sm:$0xff]  }
 0x3f1   :  { %1324 = vperm.xlu0 %1875, %v1309_v47   ;;  %v1310_v8 = vunpack.c.l.b16 %v1167_v48  ;;  %v1169_v20 = vpack.c.bf16 %v1152_v51, %v1152_v51  ;;  %1821 = vmatprep.subr.bf16.mxu0 %v2153_v40  ;;  %v1886_v48 = vld [vmem:[#allocation7] sm:$0xff]  }
 0x3f2   :  { %1321 = vperm.xlu1 %1876, %v1308_v4   ;;  %v1313_v55 = vunpack.c.l.b16 %v1170_v52  ;;  %v1890_v52 = vld [vmem:[#allocation7 + $0x10] sm:$0xff]  }
 0x3f3   :  { %v1312_v53 = vunpack.c.l.b16 %v1169_v20  ;;  %v1894_v20 = vld [vmem:[#allocation7 + $0x20] sm:$0xff]  }
 0x3f4   :  { %1822 = vmatpush3.bf16.msra.mxu0 %v1887_v56  ;;  %v1898_v56 = vld [vmem:[#allocation7 + $0x30] sm:$0xff]  }
 0x3f5   :  { %1330 = vperm.xlu0 %1875, %v1311_v17   ;;  %1823 = vmatprep.subr.bf16.mxu0 %v2153_v40  ;;  %v1888_v17 = vld [vmem:[#allocation7 + $0x8] sm:$0xff]  }
 0x3f6   :  { %1327 = vperm.xlu1 %1876, %v1310_v8   ;;  %v1893_v8 = vld [vmem:[#allocation8 + $0x20] sm:$0xff]  }
 0x3f8   :  { %1824 = vmatpush3.bf16.msra.mxu0 %v1889_v37  ;;  %v1899_v37 = vld [vmem:[#allocation8 + $0x38] sm:$0xff]  }
 0x3f9   :  { %1336 = vperm.xlu0 %1875, %v1313_v55   ;;  %1825 = vmatprep.subr.bf16.mxu0 %v2153_v40  ;;  %v1895_v55 = vld [vmem:[#allocation8 + $0x28] sm:$0xff]  }
 0x3fa   :  { %1333 = vperm.xlu1 %1876, %v1312_v53   ;;  %v1896_v53 = vld [vmem:[#allocation7 + $0x28] sm:$0xff]  }
 0x3fc   :  { %1826 = vmatpush3.bf16.msra.mxu0 %v1891_v62  ;;  %v1716_v62 = vcombine.low %v2610_v16, %v2642_v7 }
 0x3fd   :  { %1827 = vmatprep.subr.bf16.mxu0 %v2153_v40 }
 0x400   :  { %1828 = vmatpush3.bf16.msra.mxu0 %v1893_v8 }
 0x401   :  { %1829 = vmatprep.subr.bf16.mxu0 %v2153_v40 }
 0x404   :  { %1830 = vmatpush3.bf16.msra.mxu0 %v1895_v55 }
 0x405   :  { %1831 = vmatprep.subr.bf16.mxu0 %v2153_v40 }
 0x408   :  { %1832 = vmatpush3.bf16.msra.mxu0 %v1897_v19 }
 0x409   :  { %1833 = vmatprep.subr.bf16.mxu0 %v2153_v40 }
 0x40c   :  { %1834 = vmatpush3.bf16.msra.mxu0 %v1899_v37 }
 0x40f   :  { %1836 = vmatmul.mubr.bf16.vlgmr.msra.gmra.mrb[16].mxu0 %v1716_v62 }
 0x45b   :  { %v1192_v35 = vpop.permute.xlu1 %1191 }
 0x45c   :  { %v1189_v63 = vpop.permute.xlu0 %1188  ;;  %v1218_v31 = vrot.slane %v1192_v35, %v2377_v14  ;;  %v1901_v35 = vld [vmem:[#allocation7 + $0x38] sm:$0xff]  }
 0x45d   :  { %v1214_v34 = vrot.slane %v1189_v63, %v2377_v14 }
 0x45f   :  { %v1195_v3 = vpop.permute.xlu1 %1194  ;;  %v1243_v11 = vsel %vm731_vm0, %v1218_v31, %v1214_v34 }
 0x460   :  { %v1222_v42 = vrot.slane %v1195_v3, %v2377_v14  ;;  %v1198_v44 = vpop.permute.xlu0 %1197 }
 0x461   :  { %v1226_v21 = vrot.slane %v1198_v44, %v2377_v14 }
 0x462   :  { %v1244_v13 = vsel %vm733_vm1, %v1222_v42, %v1243_v11 }
 0x463   :  { %v1201_v54 = vpop.permute.xlu1 %1200  ;;  %v1245_v24 = vsel %vm735_vm2, %v1226_v21, %v1244_v13 }
 0x464   :  { %v1230_v59 = vrot.slane %v1201_v54, %v2377_v14  ;;  %v1204_v22 = vpop.permute.xlu0 %1203 }
 0x465   :  { %v1234_v58 = vrot.slane %v1204_v22, %v2377_v14 }
 0x466   :  { %v1246_v10 = vsel %vm737_vm3, %v1230_v59, %v1245_v24  ;;  %v1733_v24 = vld [vmem:[#allocation10 + $0x2] ss:$0 sm:$0xff] }
 0x467   :  { %v1207_v9 = vpop.permute.xlu1 %1206  ;;  %v1247_v28 = vsel %vm739_vm4, %v1234_v58, %v1246_v10 }
 0x468   :  { %v1238_v27 = vrot.slane %v1207_v9, %v2377_v14  ;;  %v1210_v1 = vpop.permute.xlu0 %1209  ;;  %v1734_v9 = vld [vmem:[#allocation10 + $0x3] ss:$0 sm:$0xff] }
 0x469   :  { %v1242_v61 = vrot.slane %v1210_v1, %v2377_v14 }
 0x46a   :  { %v1248_v60 = vsel %vm741_vm5, %v1238_v27, %v1247_v28 }
 0x46b   :  { %v1249_v2 = vsel %vm743_vm6, %v1242_v61, %v1248_v60 }
 0x46c   :  { %v1250_v5 = vpack.c.b16 %v1249_v2, %v1249_v2  ;;  %v1319_v26 = vpop.permute.xlu0 %1318 }
 0x46d   :  { %v1316_v15 = vpop.permute.xlu1 %1315  ;;  %v1345_v30 = vrot.slane %v1319_v26, %v2377_v14 }
 0x46e   :  { %1810 = vmatmul.mubr.msk.bf16.vlgmr.msra.gmra.mrb[0].mxu1 %vm754_vm7, %v1250_v5  ;;  %v1341_v12 = vrot.slane %v1316_v15, %v2377_v14 }
 0x46f   :  { %1814 = vmatpush3.bf16.msra.mxu1 %v1382_v29  ;;  %1815 = vmatprep.mubr.msk.bf16.mxu1 %vm2154_vm9, %v2153_v40 }
 0x470   :  { %v1325_v32 = vpop.permute.xlu0 %1324  ;;  %1839 = vmatprep.subr.bf16.mxu1 %v2153_v40  ;;  %v1370_v36 = vsel %vm731_vm0, %v1345_v30, %v1341_v12 }
 0x471   :  { %v1322_v23 = vpop.permute.xlu1 %1321  ;;  %v1353_v25 = vrot.slane %v1325_v32, %v2377_v14 }
 0x472   :  { %v1349_v6 = vrot.slane %v1322_v23, %v2377_v14 }
 0x474   :  { %v1371_v38 = vsel %vm733_vm1, %v1349_v6, %v1370_v36  ;;  %v1331_v39 = vpop.permute.xlu0 %1330 }
 0x475   :  { %v1328_v41 = vpop.permute.xlu1 %1327  ;;  %v1372_v57 = vsel %vm735_vm2, %v1353_v25, %v1371_v38  ;;  %v1361_v45 = vrot.slane %v1331_v39, %v2377_v14 }
 0x476   :  { %v1357_v43 = vrot.slane %v1328_v41, %v2377_v14 }
 0x478   :  { %v1373_v46 = vsel %vm737_vm3, %v1357_v43, %v1372_v57  ;;  %v1337_v0 = vpop.permute.xlu0 %1336 }
 0x479   :  { %v1334_v33 = vpop.permute.xlu1 %1333  ;;  %v1369_v50 = vrot.slane %v1337_v0, %v2377_v14  ;;  %v1374_v18 = vsel %vm739_vm4, %v1361_v45, %v1373_v46 }
 0x47a   :  { %v1365_v47 = vrot.slane %v1334_v33, %v2377_v14  ;;  %v1892_v14 = vld [vmem:[#allocation7 + $0x18] sm:$0xff]  }
 0x47c   :  { %v1375_v49 = vsel %vm741_vm5, %v1365_v47, %v1374_v18 }
 0x47d   :  { %v1376_v4 = vsel %vm743_vm6, %v1369_v50, %v1375_v49 }
 0x47e   :  { %v1377_v51 = vpack.c.b16 %v1376_v4, %v1376_v4 }
 0x480   :  { %1816 = vmatmul.mubr.msk.bf16.vlgmr.msra.gmra.mrb[4].mxu1 %vm754_vm7, %v1377_v51 }
 0x481   :  { %1840 = vmatpush3.bf16.msra.mxu1 %v1886_v48  ;;  %1855 = vmatprep.mubr.msk.bf16.mxu1 %vm2154_vm9, %v2153_v40 }
 0x482   :  { %1841 = vmatprep.subr.bf16.mxu1 %v2153_v40 }
 0x485   :  { %1842 = vmatpush3.bf16.msra.mxu1 %v1888_v17 }
 0x486   :  { %1843 = vmatprep.subr.bf16.mxu1 %v2153_v40 }
 0x489   :  { %1844 = vmatpush3.bf16.msra.mxu1 %v1890_v52 }
 0x48a   :  { %1845 = vmatprep.subr.bf16.mxu1 %v2153_v40 }
 0x48d   :  { %1846 = vmatpush3.bf16.msra.mxu1 %v1892_v14 }
 0x48e   :  { %1847 = vmatprep.subr.bf16.mxu1 %v2153_v40 }
 0x491   :  { %1848 = vmatpush3.bf16.msra.mxu1 %v1894_v20 }
 0x492   :  { %1849 = vmatprep.subr.bf16.mxu1 %v2153_v40 }
 0x495   :  { %1850 = vmatpush3.bf16.msra.mxu1 %v1896_v53 }
 0x496   :  { %1851 = vmatprep.subr.bf16.mxu1 %v2153_v40 }
 0x499   :  { %1852 = vmatpush3.bf16.msra.mxu1 %v1898_v56 }
 0x49a   :  { %1853 = vmatprep.subr.bf16.mxu1 %v2153_v40 }
 0x49d   :  { %1854 = vmatpush3.bf16.msra.mxu1 %v1901_v35 }
 0x4e2   :  { %v1543_v54 = vpop.f32.mrb[16].mxu0 }
 0x4e3   :  { %v1837_v59 = vpop.f32.mrb[17].mxu0 }
 0x4e4   :  { %v1546_v22 = vpop.f32.mrb[18].mxu0 }
 0x4e5   :  { %v1838_v40 = vpop.f32.mrb[19].mxu0 }
 0x541   :  { %v1292_v63 = vpop.f32.mrb[0].mxu1 }
 0x542   :  { %v1811_v31 = vpop.f32.mrb[1].mxu1 }
 0x543   :  { %v1295_v34 = vpop.f32.mrb[2].mxu1 }
 0x544   :  { %v1812_v3 = vpop.f32.mrb[3].mxu1 }
 0x553   :  { %v1418_v42 = vpop.f32.mrb[4].mxu1 }
 0x554   :  { %v1424_v44 = vpack.c.bf16 %v1418_v42, %v1292_v63  ;;  %v1817_v11 = vpop.f32.mrb[5].mxu1 }
 0x555   :  { %v1421_v21 = vpop.f32.mrb[6].mxu1 }
 0x556   :  { %v1818_v13 = vpop.f32.mrb[7].mxu1  ;;  %1856 = vmatmul.mubr.bf16.vlgmr.msra.gmra.mrb[8].mxu1 %v1424_v44 }
 0x629   :  { %v1632_v58 = vpop.f32.mrb[8].mxu1 }
 0x62a   :  { %v1633_v16 = vadd.f32 %v1632_v58, %v1543_v54  ;;  %v1857_v10 = vpop.f32.mrb[9].mxu1 }
 0x62b   :  { %v1635_v27 = vpop.f32.mrb[10].mxu1 }
 0x62c   :  { %v1643_v1 = vmul.f32 %v1733_v24, %v1633_v16  ;;  %v1636_v28 = vadd.f32 %v1635_v27, %v1546_v22  ;;  %v1858_v61 = vpop.f32.mrb[11].mxu1 }
 0x62e   :  { %v1649_v60 = vadd.f32 %v1734_v9, %v1643_v1  ;;  %v1644_v2 = vmul.f32 %v1733_v24, %v1636_v28 }
 0x630   :  { %v1651_v5 = vmin.f32 %v1649_v60, 0.0  ;;  %v1650_v7 = vadd.f32 %v1734_v9, %v1644_v2  ;;  %vm1661_vm10 = vcmp.gt.f32.partialorder %v1649_v60, 0.0 }
 0x632   :  { %v1653_v29 = vmul.f32 1.442695, %v1651_v5  ;;  %v1652_v26 = vmin.f32 %v1650_v7, 0.0  ;;  %vm1662_vm11 = vcmp.gt.f32.partialorder %v1650_v7, 0.0 }
 0x634   :  { %1998 = vpow2.f32 %v1653_v29  ;;  %v1655_v15 = vmul.f32 1.442695, %v1652_v26 }
 0x636   :  { %2000 = vpow2.f32 %v1655_v15 }
 0x63e   :  { %v1999_v12 = vpop.eup %1998 }
 0x63f   :  { %v1735_v30 = vadd.f32 -1.0, %v1999_v12 }
 0x640   :  { %v2001_v32 = vpop.eup %2000 }
 0x641   :  { %v1659_v23 = vmul.f32 1.6732632, %v1735_v30  ;;  %v1736_v6 = vadd.f32 -1.0, %v2001_v32 }
 0x643   :  { %v1663_v36 = vsel %vm1661_vm10, %v1649_v60, %v1659_v23  ;;  %v1660_v25 = vmul.f32 1.6732632, %v1736_v6 }
 0x644   :  { %v1665_v38 = vmul.f32 1.050701, %v1663_v36 }
 0x645   :  { %v1664_v39 = vsel %vm1662_vm11, %v1650_v7, %v1660_v25 }
 0x646   :  { %1667 = vst [vmem:[#allocation11] sm:$0xff] %v1665_v38  ;;  %v1666_v41 = vmul.f32 1.050701, %v1664_v39 }
 0x648   :  { %1668 = vst [vmem:[#allocation11 + $0x8] sm:$0xff] %v1666_v41 }
 0x649   :  { %2125 = shalt.err (!%p2122_p2)
}
 0x64a   :  { %s2126_s3 = scalar_lea.hbm %s2697_s5, 256 }
 0x64b   :  { %p2127_p3 = scmp.ne.s32.totalorder %s2697_s5, %s2126_s3  ;;  %p2130_p4 = scmp.lt.u32.totalorder %s2126_s3, %s2697_s5 }
 0x64d   :  { %p2132_p5 = pnand %p2130_p4, %p2127_p3 }
 0x64f   :  { %2135 = shalt.err (!%p2132_p5)
}
 0x650   :  { %s2156_s10 = smov 128   ;;  %s2157_s11 = smov 8  }
 0x651   :  { %1680 = dma.vmem_to_hbm [thread:$0]  %s1675_s6, 256, %s2697_s5, [#allocation4], %s2156_s10, %s2156_s10, %s2157_s11  }
 0x652   :  { %2142 = dma.done.wait [#allocation4], 256  }
 0x653   :  { %2143 = vsyncadd [#allocation4], 4294967040 }
 0x654   :  { %1684 = vsyncpa [#allocation3], 1 }
 0x655   :  { %1685 = vsyncpa [#allocation6], 1 }
 0x656   :  { %1686 = vsyncpa [#allocation9], 1 }
 0x657   :  { %1687 = vsyncpa [#allocation4], 1 }

</bundles_post_ra>
